<compile_context>
chip_gen: v5e
topology: v5e:2x2
jax: 0.10.0
libtpu: 0.0.40
codegen_flags: <defaults>
</compile_context>

<pallas_src>
import jax
import jax.numpy as jnp
from jax.experimental import pallas as pl
from jax.experimental.pallas import tpu as pltpu


_LANE = 128
_MIB = 1024 * 1024
_MIN_SPLIT_BYTES = 2 * _MIB          # force >=2 blocks above this on 2-TC chips
_DEFAULT_MIN_PALLAS_BYTES = 2 * _MIB  # below this, let XLA fuse the add


def _tpu_vmem_capacity_bytes():
    try:
        info = pltpu.get_tpu_info()
        cap = getattr(info, "vmem_capacity_bytes", None)
        if cap:
            return int(cap)
    except Exception:
        pass
    return None


_VMEM_CAPACITY = _tpu_vmem_capacity_bytes()
if _VMEM_CAPACITY is not None and _VMEM_CAPACITY >= 100 * _MIB:
    # v5e / v6e: 128 MiB physical VMEM, single TensorCore.
    _MAX_BLOCK_BYTES = 8 * _MIB
    _LIKELY_TWO_TC = False
else:
    # v7x (64 MiB per-TC VMEM, 2 TCs) or unknown: stay conservative.
    _MAX_BLOCK_BYTES = 3 * _MIB
    _LIKELY_TWO_TC = _VMEM_CAPACITY is not None


def _add_pe_kernel(x_ref, pe_ref, o_ref):
    # x_ref: (block_b, block_n); pe_ref: (1, block_n) broadcast over the batch
    # (sublane) axis; pure VPU elementwise add, lane-dense stores.
    o_ref[...] = x_ref[...] + pe_ref[...]


def _sublane_multiple(itemsize):
    if itemsize >= 4:
        return 8
    if itemsize == 2:
        return 16
    return 32


def _pick_blocks(batch, n, itemsize):
    """(block_b, block_n, packed_sublanes) honoring the (sub, 128) constraint
    while keeping each x/out block under _MAX_BLOCK_BYTES."""
    sub = _sublane_multiple(itemsize)
    # Batch (sublane) axis: native packed row count; ragged batch edge is
    # masked by Pallas.  Full batch when smaller (full-dim always legal).
    block_b = sub if batch >= sub else batch

    # Flattened C*H*W (lane) axis: multiple of 128 capped by the byte budget;
    # the (possibly ragged) last tile is masked by Pallas.
    if n <= _LANE:
        block_n = n  # full dim (tiny level)
    else:
        cap = max(_LANE, (_MAX_BLOCK_BYTES // (block_b * itemsize)) // _LANE * _LANE)
        block_n = min((n // _LANE) * _LANE, cap)
    return block_b, block_n, sub


@jax.jit
def _add_pe_pallas(x, pe):
    """x: (B, C, H, W), pe: (C, H, W), pe.dtype == x.dtype -> (B, C, H, W)."""
    B, C, H, W = x.shape
    assert pe.shape == (C, H, W), (pe.shape, x.shape)
    N = C * H * W
    itemsize = x.dtype.itemsize

    # Lane-dense 2-D views: last dim is a large multiple of 128 for realistic
    # levels; small C no longer wastes sublane padding.
    x2 = x.reshape(B, N)
    pe2 = pe.reshape(1, N)

    block_b, block_n, sub = _pick_blocks(B, N, itemsize)

    # v7x: make sure both TensorCores get work on multi-MiB levels that would
    # otherwise collapse to a single-block grid.
    total_bytes = B * N * itemsize
    if (_LIKELY_TWO_TC and total_bytes >= _MIN_SPLIT_BYTES and block_n > _LANE
            and pl.cdiv(B, block_b) * pl.cdiv(N, block_n) < 2):
        block_n = max(_LANE, (block_n // 2 // _LANE) * _LANE)

    nb = pl.cdiv(B, block_b)
    nn = pl.cdiv(N, block_n)

    # Honest VMEM budget: double-buffered x and out blocks plus the pe block,
    # sublane-padded from 1 row up to the packed row count.
    x_block_bytes = block_b * block_n * itemsize
    pe_block_bytes = sub * block_n * itemsize
    working = 2 * (2 * x_block_bytes + pe_block_bytes)
    vmem_limit = working + 8 * _MIB
    if _VMEM_CAPACITY is not None:
        vmem_limit = min(vmem_limit, int(0.9 * _VMEM_CAPACITY))
    else:
        vmem_limit = min(vmem_limit, 48 * _MIB)  # safe on every generation
    vmem_limit = max(vmem_limit, 16 * _MIB)

    out = pl.pallas_call(
        _add_pe_kernel,
        out_shape=jax.ShapeDtypeStruct((B, N), x.dtype),
        grid_spec=pltpu.PrefetchScalarGridSpec(
            num_scalar_prefetch=0,
            # n-tiles outer, batch tiles inner: pe's block index is constant
            # across the inner batch sweep, so the reused pe tile stays
            # resident in VMEM (no re-DMA per batch step).
            grid=(nn, nb),
            in_specs=[
                pl.BlockSpec((block_b, block_n), lambda j, i: (i, j)),  # x
                pl.BlockSpec((1, block_n), lambda j, i: (0, j)),        # pe
            ],
            out_specs=pl.BlockSpec((block_b, block_n), lambda j, i: (i, j)),
        ),
        compiler_params=pltpu.CompilerParams(
            dimension_semantics=("parallel", "parallel"),
            vmem_limit_bytes=int(vmem_limit),
        ),
    )(x2, pe2)
    return out.reshape(B, C, H, W)


def _add_positional_embedding(x, pe, min_pallas_bytes=_DEFAULT_MIN_PALLAS_BYTES):
    # Tiny pyramid levels: pallas_call is a fusion barrier with fixed
    # custom-call overhead, so let XLA fuse the broadcast-add instead.
    if x.size * x.dtype.itemsize < min_pallas_bytes:
        return x + pe[None]
    return _add_pe_pallas(x, pe)


class MultiscalePositionalEmbeddingWrapper:
    """JAX/Pallas port of the PyTorch MultiscalePositionalEmbeddingWrapper."""

    def __init__(
        self,
        base_target,               # kept for signature parity; unused (learned PE assumed)
        base_num_features,
        base_grid_height,
        base_grid_width,
        channel_mults,
        down_scales,
        *,
        key,
        min_pallas_bytes=_DEFAULT_MIN_PALLAS_BYTES,
    ):
        assert len(down_scales) == len(channel_mults)
        del base_target
        self.min_pallas_bytes = min_pallas_bytes
        self.pe_params = []
        self._pe_cache = {}  # (level_id, dtype name) -> pre-cast pe
        for lvl_id, (ch_mult, scale) in enumerate(zip(channel_mults, down_scales)):
            gh = base_grid_height // scale
            gw = base_grid_width // scale
            nf = base_num_features * ch_mult
            k = jax.random.fold_in(key, lvl_id)
            # deterministic synthetic init (matches nn.Parameter shape (nf, gh, gw))
            pe = 0.02 * jax.random.normal(k, (nf, gh, gw), dtype=jnp.float32)
            self.pe_params.append(pe)

    def _pe_for(self, level_id, dtype):
        cache_key = (level_id, jnp.dtype(dtype).name)
        pe = self._pe_cache.get(cache_key)
        if pe is None:
            # NOTE: casting pe to the activation dtype (e.g. bf16) trades a
            # little precision vs. the fp32-parameter PyTorch module for half
            # the HBM traffic on this bandwidth-bound add.  Cached so the cast
            # (a full pe round trip) happens once per (level, dtype).
            pe = self.pe_params[level_id].astype(dtype)
            self._pe_cache[cache_key] = pe
        return pe

    def __call__(self, x, level_id, *args, **kwargs):
        pe = self._pe_for(level_id, x.dtype)
        return _add_positional_embedding(x, pe, self.min_pallas_bytes)


if __name__ == "__main__":
    key = jax.random.PRNGKey(0)
    k_params, k_x0, k_x1 = jax.random.split(key, 3)

    base_num_features = 4
    base_grid_height = 16
    base_grid_width = 16
    channel_mults = (1, 2)
    down_scales = (1, 2)
    batch = 2

    wrapper = MultiscalePositionalEmbeddingWrapper(
        base_target="LearnedPositionalEmbedding",
        base_num_features=base_num_features,
        base_grid_height=base_grid_height,
        base_grid_width=base_grid_width,
        channel_mults=channel_mults,
        down_scales=down_scales,
        key=k_params,
        min_pallas_bytes=0,  # force the Pallas path even at these tiny shapes
    )

    # level 0: x (2, 4, 16, 16); level 1: x (2, 8, 8, 8)   [NCHW]
    x0 = jax.random.normal(k_x0, (batch, 4, 16, 16), dtype=jnp.float32)
    x1 = jax.random.normal(k_x1, (batch, 8, 8, 8), dtype=jnp.float32)

    # references first (plain JAX broadcast add, mirrors the PyTorch forward)
    ref0 = x0 + wrapper.pe_params[0][None]
    ref1 = x1 + wrapper.pe_params[1][None]

    y0 = wrapper(x0, level_id=0)
    y1 = wrapper(x1, level_id=1)
    jax.block_until_ready((y0, y1))

    assert y0.shape == x0.shape and y0.dtype == x0.dtype
    assert y1.shape == x1.shape and y1.dtype == x1.dtype
    assert jnp.allclose(y0, ref0, atol=1e-6), "level 0 mismatch"
    assert jnp.allclose(y1, ref1, atol=1e-6), "level 1 mismatch"

    print("KERNEL_OK")
</pallas_src>

<mosaic_0001>
module attributes {stable_mosaic.version = 11 : i64} {
  func.func @_add_pe_kernel(%arg0: i32, %arg1: i32, %arg2: memref<2x1024xf32, #tpu.memory_space<vmem>>, %arg3: memref<1x1024xf32, #tpu.memory_space<vmem>>, %arg4: memref<2x1024xf32, #tpu.memory_space<vmem>>) attributes {dimension_semantics = [#tpu.dimension_semantics<parallel>, #tpu.dimension_semantics<parallel>], iteration_bounds = array<i64: 1, 1>, scalar_prefetch = 0 : i64, scratch_operands = 0 : i64, tpu.core_type = #tpu.core_type<tc>, window_params = [{transform_indices = @transform_0, window_bounds = array<i64: 2, 1024>}, {transform_indices = @transform_1, window_bounds = array<i64: 1, 1024>}, {transform_indices = @transform_2, window_bounds = array<i64: 2, 1024>}]} {
    %c0 = arith.constant 0 : index
    %c0_0 = arith.constant 0 : index
    %0 = vector.load %arg2[%c0, %c0_0] : memref<2x1024xf32, #tpu.memory_space<vmem>>, vector<2x1024xf32>
    %c0_1 = arith.constant 0 : index
    %c0_2 = arith.constant 0 : index
    %1 = vector.load %arg3[%c0_1, %c0_2] : memref<1x1024xf32, #tpu.memory_space<vmem>>, vector<1x1024xf32>
    %2 = vector.broadcast %1 : vector<1x1024xf32> to vector<2x1024xf32>
    %3 = arith.addf %0, %2 : vector<2x1024xf32>
    %c0_3 = arith.constant 0 : index
    %c0_4 = arith.constant 0 : index
    %4 = vector.load %arg4[%c0_3, %c0_4] : memref<2x1024xf32, #tpu.memory_space<vmem>>, vector<2x1024xf32>
    tpu.vector_store %arg4[%c0_3, %c0_4], %3 {strides = array<i32>} : memref<2x1024xf32, #tpu.memory_space<vmem>>, vector<2x1024xf32>,
    return
  }
  func.func @transform_0(%arg0: i32, %arg1: i32) -> (i32, i32) {
    %c0_i32 = arith.constant 0 : i32
    return %arg1, %arg0 : i32, i32
  }
  func.func @transform_1(%arg0: i32, %arg1: i32) -> (i32, i32) {
    %c0_i32 = arith.constant 0 : i32
    %c0_i32_0 = arith.constant 0 : i32
    return %c0_i32, %arg0 : i32, i32
  }
  func.func @transform_2(%arg0: i32, %arg1: i32) -> (i32, i32) {
    %c0_i32 = arith.constant 0 : i32
    return %arg1, %arg0 : i32, i32
  }
}

</mosaic_0001>

<bundles_post_ra>
// kernel: _add_pe_pallas.1
= control target key start
LH: loop header
LB: loop body
LE: loop exit
PB: predicated region body
PF: predicated region fallthrough
CT: control target
= control target key end

     0   :  { %vm29_vm0 = vcmask 1041408   ;;  %vm31_vm1 = vcmask 1045508   ;;  %vm33_vm2 = vcmask 1043456   ;;  %s82_s1 = inlined_call_operand.vmem [shape: f32[1,1024], index: 1, kind: input, shape index: {}]   ;;  %s83_s0 = inlined_call_operand.vmem [shape: f32[2,1024], index: 0, kind: input, shape index: {}]   ;;  %s84_s2 = inlined_call_operand.vmem [shape: f32[2,1024], index: 2, kind: output, shape index: {}]  }
   0x1   :  { %v13_v0 = vld [vmem:[%s82_s1] sm:$0xff]  ;;  %v12_v18 = vld [vmem:[%s83_s0 + $0x8] sm:$0xff] }
   0x2   :  { %v15_v1 = vperm.slane %v13_v0, 0  ;;  %v16_v2 = vperm.slane %v13_v0, 1  ;;  %v17_v3 = vperm.slane %v13_v0, 2  ;;  %v18_v4 = vperm.slane %v13_v0, 3  ;;  %v11_v12 = vld [vmem:[%s83_s0] sm:$0xff] }
   0x3   :  { %v19_v5 = vperm.slane %v13_v0, 4  ;;  %v20_v6 = vperm.slane %v13_v0, 5  ;;  %v21_v7 = vperm.slane %v13_v0, 6  ;;  %v22_v8 = vperm.slane %v13_v0, 7 }
   0x4   :  { %v23_v9 = vrot.slane %v16_v2, 6  ;;  %v24_v10 = vrot.slane %v17_v3, 4  ;;  %v25_v11 = vrot.slane %v18_v4, 2 }
   0x5   :  { %v26_v13 = vrot.slane %v20_v6, 6  ;;  %v27_v14 = vrot.slane %v21_v7, 4  ;;  %v28_v15 = vrot.slane %v22_v8, 2 }
   0x6   :  { %v30_v16 = vsel %vm29_vm0, %v15_v1, %v23_v9  ;;  %v32_v17 = vsel %vm31_vm1, %v24_v10, %v25_v11 }
   0x7   :  { %v34_v19 = vsel %vm33_vm2, %v30_v16, %v32_v17  ;;  %v35_v20 = vsel %vm29_vm0, %v19_v5, %v26_v13  ;;  %v36_v21 = vsel %vm31_vm1, %v27_v14, %v28_v15 }
   0x8   :  { %v40_v22 = vadd.f32 %v34_v19, %v11_v12  ;;  %v37_v23 = vsel %vm33_vm2, %v35_v20, %v36_v21 }
   0x9   :  { %v41_v24 = vadd.f32 %v37_v23, %v12_v18 }
   0xa   :  { %42 = vst [vmem:[%s84_s2] sm:$0xff] %v40_v22 }
   0xb   :  { %43 = vst [vmem:[%s84_s2 + $0x8] sm:$0xff] %v41_v24 }

</bundles_post_ra>
